<compile_context>
chip_gen: v7x
topology: tpu7x:2x2x1
jax: 0.10.0
libtpu: 0.0.40
codegen_flags: <defaults>
</compile_context>

<pallas_src>
import jax
import jax.numpy as jnp
from jax.experimental import pallas as pl
from jax.experimental.pallas import tpu as pltpu

ENCODER_OUTPUT_CHANNELS = 8

_TARGET_BLOCK_BYTES = 2 << 20   # ~2 MiB of bf16 patches per grid step
_MAX_LANE_TILE = 16384          # lane-tile cap (multiple of 128)


def _round_up(x, m):
    return (x + m - 1) // m * m


# ----------------------------- Pallas kernel --------------------------------
def _matmul_bias_relu_kernel(p_ref, w_ref, b_ref, o_ref):
    """One lane-tile grid step: o = relu(W @ P_tile + b).

    p_ref: (K, TL)    bf16  channel-major im2col patches, batch*spatial on lanes
    w_ref: (Cout, K)  bf16  weights (resident across the grid)
    b_ref: (Cout, 1)  f32   bias (resident)
    o_ref: (Cout, TL)       lane-dense output tile (TL is a multiple of 128)
    """
    acc = jnp.dot(w_ref[...], p_ref[...], preferred_element_type=jnp.float32)
    acc = acc + b_ref[...]                       # (Cout, 1) broadcasts along lanes
    o_ref[...] = jnp.maximum(acc, 0.0).astype(o_ref.dtype)


def _choose_lane_tile(k_rows, n_lanes):
    """Lane tile (multiple of 128) holding ~2 MiB of bf16 patch data per step."""
    l128 = _round_up(n_lanes, 128)
    tl = (_TARGET_BLOCK_BYTES // (k_rows * 2)) // 128 * 128
    tl = max(128, min(tl, _MAX_LANE_TILE, l128))
    # v7x has two TensorCores: keep >= 2 steps on the "parallel" axis when there is
    # enough work to split. (No-op for the tiny demo shapes.)
    if l128 // tl < 2 and l128 >= 256:
        tl = _round_up(l128 // 2, 128)
    return tl, _round_up(n_lanes, tl)


def _conv_matmul_relu(patches, w_mat, bias, out_dtype):
    """patches: (K, L) bf16 with L = N*Ho*Wo; w_mat: (Cout, K) bf16; bias: (Cout,) f32.

    Returns relu(W @ patches + b) of shape (Cout, L) in `out_dtype`, computed by a
    lane-tiled, software-pipelined pallas_call (1-D "parallel" grid over lane tiles).
    """
    K, L = patches.shape
    Cout = w_mat.shape[0]

    # Zero-pad the contraction dim to a multiple of 16 (bf16 sublane packing; 27 -> 32).
    Kp = _round_up(K, 16)
    if Kp != K:
        patches = jnp.pad(patches, ((0, Kp - K), (0, 0)))
        w_mat = jnp.pad(w_mat, ((0, 0), (0, Kp - K)))

    tl, l_pad = _choose_lane_tile(Kp, L)
    if l_pad != L:
        # Only the (small) tail tile ever gets padded; padded columns compute relu(b)
        # and are sliced off below before anything consumes them.
        patches = jnp.pad(patches, ((0, 0), (0, l_pad - L)))

    out = pl.pallas_call(
        _matmul_bias_relu_kernel,
        out_shape=jax.ShapeDtypeStruct((Cout, l_pad), out_dtype),
        grid_spec=pltpu.PrefetchScalarGridSpec(
            num_scalar_prefetch=0,
            grid=(l_pad // tl,),
            in_specs=[
                # Patch stream, ~2 MiB/step. If profiling ever shows exposed DMA,
                # add pipeline_mode=pl.Buffered(3) here.
                pl.BlockSpec((Kp, tl), lambda m: (0, m)),
                pl.BlockSpec((Cout, Kp), lambda m: (0, 0)),   # resident weights
                pl.BlockSpec((Cout, 1), lambda m: (0, 0)),    # resident bias
            ],
            out_specs=pl.BlockSpec((Cout, tl), lambda m: (0, m)),
        ),
        # Double-buffered VMEM stays < ~5 MiB, far under the scoped default on
        # v5e/v6e/v7x, so no vmem_limit_bytes override is needed.
        compiler_params=pltpu.CompilerParams(
            dimension_semantics=("parallel",)),
    )(patches, w_mat, bias.reshape(Cout, 1).astype(jnp.float32))

    return out[:, :L] if l_pad != L else out


# ------------------------------ JAX glue -------------------------------------
def _im2col_cnhw(x_cnhw, stride=2, pad=1, k=3):
    """Channel-major patches: (k*k*C, N*Ho*Wo). K ordered (kh, kw, cin); lanes (n, i, j)."""
    C, N, H, W = x_cnhw.shape
    Ho = (H + 2 * pad - k) // stride + 1
    Wo = (W + 2 * pad - k) // stride + 1
    xp = jnp.pad(x_cnhw, ((0, 0), (0, 0), (pad, pad), (pad, pad)))
    taps = []
    for i in range(k):
        for j in range(k):
            taps.append(
                jax.lax.slice(
                    xp,
                    (0, 0, i, j),
                    (C, N, i + stride * (Ho - 1) + 1, j + stride * (Wo - 1) + 1),
                    (1, 1, stride, stride)))
    p = jnp.stack(taps, axis=0)                  # (k*k, C, N, Ho, Wo)
    return p.reshape(k * k * C, N * Ho * Wo), Ho, Wo


def _weight_to_mat(w_oihw):
    """torch (Cout, Cin, kh, kw) -> (Cout, kh*kw*Cin), matching the im2col K order."""
    cout, cin, kh, kw = w_oihw.shape
    return jnp.transpose(w_oihw, (0, 2, 3, 1)).reshape(cout, kh * kw * cin)


def init_color_encoder_params(key):
    """Deterministic parameter init matching the nn.Module shapes."""
    k1, k2, k3, k4 = jax.random.split(key, 4)
    w1 = jax.random.normal(k1, (16, 3, 3, 3), jnp.float32) * 0.1         # Conv2d(3,16,3)
    b1 = jax.random.normal(k2, (16,), jnp.float32) * 0.1
    w2 = jax.random.normal(k3, (ENCODER_OUTPUT_CHANNELS, 16, 3, 3), jnp.float32) * 0.1
    b2 = jax.random.normal(k4, (ENCODER_OUTPUT_CHANNELS,), jnp.float32) * 0.1
    return {"w1": w1, "b1": b1, "w2": w2, "b2": b2}


def color_encoder_forward(params, x_nchw):
    """Forward pass equivalent to ColorEncoder.forward. Input/output are NCHW."""
    N = x_nchw.shape[0]
    w1 = _weight_to_mat(params["w1"]).astype(jnp.bfloat16)
    w2 = _weight_to_mat(params["w2"]).astype(jnp.bfloat16)

    # (C, N, H, W) pipeline layout: the only layout transposes are on the tiny
    # input and final output tensors; nothing between the two conv layers.
    x = jnp.transpose(x_nchw, (1, 0, 2, 3)).astype(jnp.bfloat16)

    # Conv1 + ReLU (3 -> 16, k=3, s=2, p=1); bf16 streams, f32 accumulate.
    p1, H1, W1 = _im2col_cnhw(x)                              # (27, N*H1*W1)
    y1 = _conv_matmul_relu(p1, w1, params["b1"], jnp.bfloat16)
    y1 = y1.reshape(16, N, H1, W1)                            # free reshape, stays bf16

    # Conv2 + ReLU (16 -> 8, k=3, s=2, p=1); final output in f32.
    p2, H2, W2 = _im2col_cnhw(y1)                             # (144, N*H2*W2)
    y2 = _conv_matmul_relu(p2, w2, params["b2"], jnp.float32)
    y2 = y2.reshape(ENCODER_OUTPUT_CHANNELS, N, H2, W2)
    return jnp.transpose(y2, (1, 0, 2, 3))


def _reference_forward(params, x_nchw):
    """Pure-XLA float32 reference (tolerance check for the bf16 kernel path)."""
    dn = ("NCHW", "OIHW", "NCHW")
    y = jax.lax.conv_general_dilated(x_nchw, params["w1"], (2, 2), ((1, 1), (1, 1)),
                                     dimension_numbers=dn)
    y = jnp.maximum(y + params["b1"][None, :, None, None], 0.0)
    y = jax.lax.conv_general_dilated(y, params["w2"], (2, 2), ((1, 1), (1, 1)),
                                     dimension_numbers=dn)
    return jnp.maximum(y + params["b2"][None, :, None, None], 0.0)


if __name__ == "__main__":
    key = jax.random.PRNGKey(0)
    k_param, k_x = jax.random.split(key)
    params = init_color_encoder_params(k_param)

    # Small input consistent with the module: batch=2, RGB channels=3, 16x16 spatial.
    x = jax.random.normal(k_x, (2, 3, 16, 16), jnp.float32)

    fwd = jax.jit(color_encoder_forward)
    out = jax.block_until_ready(fwd(params, x))
    assert out.shape == (2, ENCODER_OUTPUT_CHANNELS, 4, 4), out.shape

    # Tolerance-based reference check (bf16 streams vs f32 reference).
    ref = jax.block_until_ready(_reference_forward(params, x))
    max_err = float(jnp.max(jnp.abs(out - ref)))
    assert max_err < 5e-2, f"max abs error vs reference: {max_err}"
    print("KERNEL_OK")
</pallas_src>

<mosaic_0001>
module attributes {stable_mosaic.version = 11 : i64} {
  func.func @_matmul_bias_relu_kernel(%arg0: i32, %arg1: memref<32x128xbf16, #tpu.memory_space<vmem>>, %arg2: memref<16x32xbf16, #tpu.memory_space<vmem>>, %arg3: memref<16x1xf32, #tpu.memory_space<vmem>>, %arg4: memref<16x128xbf16, #tpu.memory_space<vmem>>) attributes {dimension_semantics = [#tpu.dimension_semantics<parallel>], iteration_bounds = array<i64: 1>, scalar_prefetch = 0 : i64, scratch_operands = 0 : i64, tpu.core_type = #tpu.core_type<tc>, window_params = [{transform_indices = @transform_0, window_bounds = array<i64: 32, 128>}, {pipeline_mode = #tpu.pipeline_mode<synchronous>, transform_indices = @transform_1, window_bounds = array<i64: 16, 32>}, {pipeline_mode = #tpu.pipeline_mode<synchronous>, transform_indices = @transform_2, window_bounds = array<i64: 16, 1>}, {transform_indices = @transform_3, window_bounds = array<i64: 16, 128>}]} {
    %c0 = arith.constant 0 : index
    %c0_0 = arith.constant 0 : index
    %0 = vector.load %arg2[%c0, %c0_0] : memref<16x32xbf16, #tpu.memory_space<vmem>>, vector<16x32xbf16>
    %c0_1 = arith.constant 0 : index
    %c0_2 = arith.constant 0 : index
    %1 = vector.load %arg1[%c0_1, %c0_2] : memref<32x128xbf16, #tpu.memory_space<vmem>>, vector<32x128xbf16>
    %cst = arith.constant dense<0.000000e+00> : vector<16x128xf32>
    %2 = tpu.matmul %0, %1, %cst {dimension_numbers = #tpu.dot_dimension_numbers<[1], [0], [0], [1], [0, 0, 1, 1], [], []>} : vector<16x32xbf16>, vector<32x128xbf16>, vector<16x128xf32> -> vector<16x128xf32>
    %c0_3 = arith.constant 0 : index
    %c0_4 = arith.constant 0 : index
    %3 = vector.load %arg3[%c0_3, %c0_4] : memref<16x1xf32, #tpu.memory_space<vmem>>, vector<16x1xf32>
    %4 = vector.broadcast %3 : vector<16x1xf32> to vector<16x128xf32>
    %5 = arith.addf %2, %4 : vector<16x128xf32>
    %cst_5 = arith.constant 0.000000e+00 : f32
    %6 = vector.broadcast %cst_5 : f32 to vector<16x128xf32>
    %7 = arith.maximumf %5, %6 : vector<16x128xf32>
    %8 = arith.truncf %7 : vector<16x128xf32> to vector<16x128xbf16>
    %c0_6 = arith.constant 0 : index
    %c0_7 = arith.constant 0 : index
    %9 = vector.load %arg4[%c0_6, %c0_7] : memref<16x128xbf16, #tpu.memory_space<vmem>>, vector<16x128xbf16>
    tpu.vector_store %arg4[%c0_6, %c0_7], %8 {strides = array<i32>} : memref<16x128xbf16, #tpu.memory_space<vmem>>, vector<16x128xbf16>,
    return
  }
  func.func @transform_0(%arg0: i32) -> (i32, i32) {
    %c0_i32 = arith.constant 0 : i32
    %c0_i32_0 = arith.constant 0 : i32
    return %c0_i32, %arg0 : i32, i32
  }
  func.func @transform_1(%arg0: i32) -> (i32, i32) {
    %c0_i32 = arith.constant 0 : i32
    %c0_i32_0 = arith.constant 0 : i32
    %c0_i32_1 = arith.constant 0 : i32
    return %c0_i32, %c0_i32_0 : i32, i32
  }
  func.func @transform_2(%arg0: i32) -> (i32, i32) {
    %c0_i32 = arith.constant 0 : i32
    %c0_i32_0 = arith.constant 0 : i32
    %c0_i32_1 = arith.constant 0 : i32
    return %c0_i32, %c0_i32_0 : i32, i32
  }
  func.func @transform_3(%arg0: i32) -> (i32, i32) {
    %c0_i32 = arith.constant 0 : i32
    %c0_i32_0 = arith.constant 0 : i32
    return %c0_i32, %arg0 : i32, i32
  }
}

module attributes {stable_mosaic.version = 11 : i64} {
  func.func @_matmul_bias_relu_kernel(%arg0: i32, %arg1: memref<144x128xbf16, #tpu.memory_space<vmem>>, %arg2: memref<8x144xbf16, #tpu.memory_space<vmem>>, %arg3: memref<8x1xf32, #tpu.memory_space<vmem>>, %arg4: memref<8x128xf32, #tpu.memory_space<vmem>>) attributes {dimension_semantics = [#tpu.dimension_semantics<parallel>], iteration_bounds = array<i64: 1>, scalar_prefetch = 0 : i64, scratch_operands = 0 : i64, tpu.core_type = #tpu.core_type<tc>, window_params = [{transform_indices = @transform_0, window_bounds = array<i64: 144, 128>}, {pipeline_mode = #tpu.pipeline_mode<synchronous>, transform_indices = @transform_1, window_bounds = array<i64: 8, 144>}, {pipeline_mode = #tpu.pipeline_mode<synchronous>, transform_indices = @transform_2, window_bounds = array<i64: 8, 1>}, {transform_indices = @transform_3, window_bounds = array<i64: 8, 128>}]} {
    %c0 = arith.constant 0 : index
    %c0_0 = arith.constant 0 : index
    %0 = vector.load %arg2[%c0, %c0_0] : memref<8x144xbf16, #tpu.memory_space<vmem>>, vector<8x144xbf16>
    %c0_1 = arith.constant 0 : index
    %c0_2 = arith.constant 0 : index
    %1 = vector.load %arg1[%c0_1, %c0_2] : memref<144x128xbf16, #tpu.memory_space<vmem>>, vector<144x128xbf16>
    %cst = arith.constant dense<0.000000e+00> : vector<8x128xf32>
    %2 = tpu.matmul %0, %1, %cst {dimension_numbers = #tpu.dot_dimension_numbers<[1], [0], [0], [1], [0, 0, 1, 1], [], []>} : vector<8x144xbf16>, vector<144x128xbf16>, vector<8x128xf32> -> vector<8x128xf32>
    %c0_3 = arith.constant 0 : index
    %c0_4 = arith.constant 0 : index
    %3 = vector.load %arg3[%c0_3, %c0_4] : memref<8x1xf32, #tpu.memory_space<vmem>>, vector<8x1xf32>
    %4 = vector.broadcast %3 : vector<8x1xf32> to vector<8x128xf32>
    %5 = arith.addf %2, %4 : vector<8x128xf32>
    %cst_5 = arith.constant 0.000000e+00 : f32
    %6 = vector.broadcast %cst_5 : f32 to vector<8x128xf32>
    %7 = arith.maximumf %5, %6 : vector<8x128xf32>
    %c0_6 = arith.constant 0 : index
    %c0_7 = arith.constant 0 : index
    %8 = vector.load %arg4[%c0_6, %c0_7] : memref<8x128xf32, #tpu.memory_space<vmem>>, vector<8x128xf32>
    tpu.vector_store %arg4[%c0_6, %c0_7], %7 {strides = array<i32>} : memref<8x128xf32, #tpu.memory_space<vmem>>, vector<8x128xf32>,
    return
  }
  func.func @transform_0(%arg0: i32) -> (i32, i32) {
    %c0_i32 = arith.constant 0 : i32
    %c0_i32_0 = arith.constant 0 : i32
    return %c0_i32, %arg0 : i32, i32
  }
  func.func @transform_1(%arg0: i32) -> (i32, i32) {
    %c0_i32 = arith.constant 0 : i32
    %c0_i32_0 = arith.constant 0 : i32
    %c0_i32_1 = arith.constant 0 : i32
    return %c0_i32, %c0_i32_0 : i32, i32
  }
  func.func @transform_2(%arg0: i32) -> (i32, i32) {
    %c0_i32 = arith.constant 0 : i32
    %c0_i32_0 = arith.constant 0 : i32
    %c0_i32_1 = arith.constant 0 : i32
    return %c0_i32, %c0_i32_0 : i32, i32
  }
  func.func @transform_3(%arg0: i32) -> (i32, i32) {
    %c0_i32 = arith.constant 0 : i32
    %c0_i32_0 = arith.constant 0 : i32
    return %c0_i32, %arg0 : i32, i32
  }
}

</mosaic_0001>

<bundles_post_ra>
// kernel: color_encoder_forward.2
= control target key start
LH: loop header
LB: loop body
LE: loop exit
PB: predicated region body
PF: predicated region fallthrough
CT: control target
= control target key end

     0   :  { %v142_v0 = vmov 0.0   ;;  %vm143_vm0 = vmmov 0   ;;  %v144_v2 = vmov 0   ;;  %vm50_vm1 = vcmask 261120   ;;  %s183_s0 = inlined_call_operand.vmem [shape: bf16[32,128], index: 0, kind: input, shape index: {}]   ;;  %s184_s2 = inlined_call_operand.vmem [shape: f32[16,1], index: 2, kind: input, shape index: {}]   ;;  %s185_s1 = inlined_call_operand.vmem [shape: bf16[16,32], index: 1, kind: input, shape index: {}]   ;;  %s186_s3 = inlined_call_operand.vmem [shape: bf16[16,128], index: 3, kind: output, shape index: {}]  }
   0x1   :  { %127 = vmatprep.subr.bf16.mxu0 %v142_v0  ;;  %v139_v1 = vld [vmem:[%s183_s0] sm:$0xff]   ;;  %131 = vmatprep.mubr.msk.bf16.mxu0 %vm143_vm0, %v142_v0  ;;  %v140_v3 = vld [vmem:[%s183_s0 + $0x8] sm:$0xff]  }
   0x2   :  { %138 = vset.pattern.permute.xlu0 %v144_v2  ;;  %128 = vmatpush3.bf16.msra.mxu0 %v139_v1  ;;  %v21_v4 = vld [vmem:[%s184_s2] sm:$0xff]  ;;  %v22_v6 = vld [vmem:[%s184_s2 + $0x8] sm:$0xff] }
   0x3   :  { %129 = vmatprep.subr.bf16.mxu0 %v142_v0  ;;  %25 = vperm.xlu0 %138, %v21_v4   ;;  %v141_v5 = vld [vmem:[%s185_s1] sm:$0xff]  }
   0x6   :  { %130 = vmatpush3.bf16.msra.mxu0 %v140_v3 }
   0x7   :  { %30 = vperm.xlu0 %138, %v22_v6  }
   0x9   :  { %132 = vmatmul.mubr.msk.bf16.vlgmr.msra.gmra.mrb[0].mxu0 %vm50_vm1, %v141_v5 }
  0x82   :  { %v26_v7 = vpop.permute.xlu0 %25 }
  0x86   :  { %v31_v11 = vpop.permute.xlu0 %30 }
  0xdc   :  { %v88_v8 = vpop.f32.mrb[0].mxu0 }
  0xdd   :  { %v89_v9 = vadd.f32 %v88_v8, %v26_v7  ;;  %v133_v10 = vpop.f32.mrb[1].mxu0 }
  0xde   :  { %v91_v12 = vpop.f32.mrb[2].mxu0 }
  0xdf   :  { %v92_v13 = vadd.f32 %v91_v12, %v31_v11  ;;  %v134_v14 = vpop.f32.mrb[3].mxu0  ;;  %v95_v15 = vmax.f32 %v89_v9, 0.0 }
  0xe1   :  { %v96_v16 = vmax.f32 %v92_v13, 0.0 }
  0xe3   :  { %v122_v17 = vpack.c.bf16 %v96_v16, %v95_v15 }
  0xe5   :  { %123 = vst [vmem:[%s186_s3] sm:$0xff] %v122_v17  }

// kernel: color_encoder_forward.3
= control target key start
LH: loop header
LB: loop body
LE: loop exit
PB: predicated region body
PF: predicated region fallthrough
CT: control target
= control target key end

     0   :  { %v175_v0 = vmov 0   ;;  %vm100_vm0 = vcmask 130048   ;;  %s232_s0 = inlined_call_operand.vmem [shape: bf16[144,128], index: 0, kind: input, shape index: {}]   ;;  %s233_s1 = inlined_call_operand.vmem [shape: bf16[8,144], index: 1, kind: input, shape index: {}]   ;;  %s234_s2 = inlined_call_operand.vmem [shape: f32[8,1], index: 2, kind: input, shape index: {}]   ;;  %s235_s3 = inlined_call_operand.vmem [shape: f32[8,128], index: 3, kind: output, shape index: {}]  }
   0x1   :  { %104 = vmatprep.subr.bf16.mxu0 %v175_v0  ;;  %v164_v1 = vld [vmem:[%s232_s0] sm:$0xff]   ;;  %163 = vset.pattern.permute.xlu0 %v175_v0  ;;  %v165_v2 = vld [vmem:[%s232_s0 + $0x8] sm:$0xff]   ;;  %v166_v3 = vld [vmem:[%s232_s0 + $0x10] sm:$0xff]  }
   0x2   :  { %105 = vmatpush1.bf16.msra.mxu0 %v164_v1  ;;  %v15_v4 = vld [vmem:[%s233_s1] sm:$0xff]  ;;  %v167_v6 = vld [vmem:[%s232_s0 + $0x18] sm:$0xff]   ;;  %v169_v9 = vld [vmem:[%s232_s0 + $0x28] sm:$0xff]  }
   0x3   :  { %106 = vmatprep.subr.bf16.mxu0 %v175_v0  ;;  %v34_v5 = vld [vmem:[%s234_s2] sm:$0xff]  ;;  %v151_v7 = vcombine.high %v15_v4, %v15_v4  ;;  %v170_v10 = vld [vmem:[%s232_s0 + $0x30] sm:$0xff]   ;;  %v171_v11 = vld [vmem:[%s232_s0 + $0x38] sm:$0xff]   ;;  %v150_v13 = vcombine.low %v15_v4, %v15_v4 }
   0x4   :  { %37 = vperm.xlu0 %163, %v34_v5   ;;  %v168_v8 = vld [vmem:[%s232_s0 + $0x20] sm:$0xff]  }
   0x5   :  { %161 = vmatprep.mubr.msk.bf16.mxu0 %vm100_vm0, %v151_v7  ;;  %v172_v12 = vld [vmem:[%s232_s0 + $0x40] sm:$0xff]  }
   0x6   :  { %107 = vmatpush1.bf16.msra.mxu0 %v165_v2 }
   0x7   :  { %108 = vmatprep.subr.bf16.mxu0 %v175_v0 }
   0xa   :  { %109 = vmatpush1.bf16.msra.mxu0 %v166_v3 }
   0xb   :  { %110 = vmatprep.subr.bf16.mxu0 %v175_v0 }
   0xe   :  { %111 = vmatpush1.bf16.msra.mxu0 %v167_v6 }
   0xf   :  { %112 = vmatprep.subr.bf16.mxu0 %v175_v0 }
  0x12   :  { %113 = vmatpush1.bf16.msra.mxu0 %v168_v8 }
  0x13   :  { %114 = vmatprep.subr.bf16.mxu0 %v175_v0 }
  0x16   :  { %115 = vmatpush1.bf16.msra.mxu0 %v169_v9 }
  0x17   :  { %116 = vmatprep.subr.bf16.mxu0 %v175_v0 }
  0x1a   :  { %117 = vmatpush1.bf16.msra.mxu0 %v170_v10 }
  0x1b   :  { %118 = vmatprep.subr.bf16.mxu0 %v175_v0 }
  0x1e   :  { %119 = vmatpush1.bf16.msra.mxu0 %v171_v11 }
  0x1f   :  { %120 = vmatprep.subr.bf16.mxu0 %v175_v0 }
  0x22   :  { %121 = vmatpush1.bf16.msra.mxu0 %v172_v12 }
  0x25   :  { %137 = vmatmul.mubr.bf16.vlgmr.msra.gmra.mrb[0].mxu0 %v150_v13 }
  0x83   :  { %v38_v14 = vpop.permute.xlu0 %37 }
  0xf8   :  { %v138_v15 = vpop.f32.mrb[0].mxu0 }
  0xf9   :  { %v139_v16 = vadd.f32 %v138_v15, %v38_v14  ;;  %v140_v17 = vpop.f32.mrb[1].mxu0 }
  0xfa   :  { %v141_v18 = vpop.f32.mrb[2].mxu0 }
  0xfb   :  { %v144_v19 = vmax.f32 %v139_v16, 0.0  ;;  %v142_v20 = vpop.f32.mrb[3].mxu0 }
  0xfd   :  { %145 = vst [vmem:[%s235_s3] sm:$0xff] %v144_v19 }

</bundles_post_ra>
